<compile_context>
chip_gen: v6e
topology: v6e:2x2x1
jax: 0.10.0
libtpu: 0.0.40
codegen_flags: <defaults>
</compile_context>

<pallas_src>
import functools

import jax
import jax.numpy as jnp
from jax import lax
from jax.experimental import pallas as pl
from jax.experimental.pallas import tpu as pltpu


def _make_occlusion_kernel(use_bf16_matmul: bool):
    def kernel(p_ref, x_ref, o_ref):
        # p_ref (SMEM, scalar-prefetched):
        #   [w1_0, w1_1, b1, w2_0, w2_1, b2, wm, bm]
        # x_ref (VMEM): (TB, 2, H, W) block for the current batch tile
        # o_ref (VMEM): (TB, H, W) block (channel dim squeezed via BlockSpec)

        # Hoist the scalar SMEM reads once at kernel entry.
        w1_0 = p_ref[0]
        w1_1 = p_ref[1]
        b1 = p_ref[2]
        w2_0 = p_ref[3]
        w2_1 = p_ref[4]
        b2 = p_ref[5]
        wm = p_ref[6]
        bm = p_ref[7]

        xc0 = x_ref[:, 0, :, :].astype(jnp.float32)   # (TB, H, W)
        xc1 = x_ref[:, 1, :, :].astype(jnp.float32)   # (TB, H, W)

        # convbranch1 / convbranch2: 1x1 conv (2 -> 1) + sigmoid.
        # NOTE: PyTorch forward uses convbranch2 for BOTH x2 and x3.
        x1 = jax.nn.sigmoid(w1_0 * xc0 + w1_1 * xc1 + b1)   # (TB, H, W)
        x2 = jax.nn.sigmoid(w2_0 * xc0 + w2_1 * xc1 + b2)   # (TB, H, W), x3 == x2

        if use_bf16_matmul:
            x1_m = x1.astype(jnp.bfloat16)
            x2_m = x2.astype(jnp.bfloat16)
        else:
            x1_m, x2_m = x1, x2

        # x12[b,h,k] = sum_w x2[b,h,w] * x1[b,k,w]  ==  x2 @ x1^T
        # The transpose of x1 is folded into the contraction (contract last
        # axes of both operands) -> no separate XLU transpose pass.
        x12 = lax.dot_general(
            x2_m, x1_m,
            dimension_numbers=(((2,), (2,)), ((0,), (0,))),
            preferred_element_type=jnp.float32)              # (TB, H, H)
        x12_m = x12.astype(jnp.bfloat16) if use_bf16_matmul else x12

        # x13[b,h,w] = sum_k x12[b,h,k] * x3[b,k,w]
        x13 = lax.dot_general(
            x12_m, x2_m,
            dimension_numbers=(((2,), (1,)), ((0,), (0,))),
            preferred_element_type=jnp.float32)              # (TB, H, W)

        # convmerge (1x1, 1 -> 1) + sigmoid; 1 - sigmoid(z) == sigmoid(-z).
        o_ref[...] = jax.nn.sigmoid(-(wm * x13 + bm)).astype(o_ref.dtype)

    return kernel


def occlusion_pallas(x, params, *, tile_batch=None, use_bf16_matmul=False):
    """x: (N, 2, H, W) float32.  params: (8,) float32 scalar param vector."""
    N, C, H, W = x.shape
    assert C == 2

    # Batch multiple samples per grid step to amortize per-step overhead and
    # issue fewer, denser DMAs (the biggest lever at small H, W).
    TB = tile_batch if tile_batch is not None else min(N, 8)
    TB = max(1, min(TB, N))
    n_tiles = pl.cdiv(N, TB)
    Np = n_tiles * TB
    if Np != N:
        x = jnp.pad(x, ((0, Np - N), (0, 0), (0, 0), (0, 0)))

    grid_spec = pltpu.PrefetchScalarGridSpec(
        num_scalar_prefetch=1,
        grid=(n_tiles,),
        in_specs=[
            pl.BlockSpec((TB, 2, H, W), lambda n, p: (n, 0, 0, 0)),
        ],
        # Squeeze the singleton channel dim so the kernel does a plain
        # full-tile (TB, H, W) store.
        out_specs=pl.BlockSpec((TB, None, H, W), lambda n, p: (n, 0, 0, 0)),
    )

    cost = pl.CostEstimate(
        flops=int(Np) * 4 * H * H * W,          # two (H,W)x(W,H)/(H,H)x(H,W) matmuls
        transcendentals=int(Np) * 3 * H * W,    # three sigmoid passes per sample
        bytes_accessed=int(Np) * 3 * H * W * 4 + 32,
    )

    out = pl.pallas_call(
        _make_occlusion_kernel(use_bf16_matmul),
        out_shape=jax.ShapeDtypeStruct((Np, 1, H, W), jnp.float32),
        grid_spec=grid_spec,
        compiler_params=pltpu.CompilerParams(
            # TODO(synk): on v7x use CORE_PARALLEL to shard the batch axis
            # across both TensorCores; plain "parallel" is safe everywhere.
            dimension_semantics=("parallel",),
            vmem_limit_bytes=64 * 1024 * 1024,
        ),
        cost_estimate=cost,
    )(params, x)

    if Np != N:
        out = out[:N]
    return out


def occlusion_reference(x, params):
    """Pure-JAX reference mirroring the PyTorch forward exactly."""
    w1_0, w1_1, b1, w2_0, w2_1, b2, wm, bm = [params[i] for i in range(8)]
    x_c0 = x[:, 0:1]          # (N, 1, H, W)
    x_c1 = x[:, 1:2]
    x1 = jax.nn.sigmoid(w1_0 * x_c0 + w1_1 * x_c1 + b1)
    x1 = jnp.swapaxes(x1, -2, -1)                         # (N, 1, W, H)
    x2 = jax.nn.sigmoid(w2_0 * x_c0 + w2_1 * x_c1 + b2)   # (N, 1, H, W)
    x3 = x2
    x12 = jnp.matmul(x2, x1)                              # (N, 1, H, H)
    x13 = jnp.matmul(x12, x3)                             # (N, 1, H, W)
    return 1.0 - jax.nn.sigmoid(wm * x13 + bm)


if __name__ == "__main__":
    # Deterministic synthetic parameters (Conv2d 1x1 weights/biases flattened):
    # [convbranch1.w(2), convbranch1.b, convbranch2.w(2), convbranch2.b,
    #  convmerge.w, convmerge.b]
    params = jnp.array(
        [0.25, -0.40, 0.10,      # convbranch1
         -0.15, 0.30, -0.05,     # convbranch2
         0.20, 0.05],            # convmerge
        dtype=jnp.float32)

    key = jax.random.PRNGKey(0)
    N, C, H, W = 2, 2, 16, 16
    x = jax.random.normal(key, (N, C, H, W), dtype=jnp.float32)

    out = occlusion_pallas(x, params)
    out = jax.block_until_ready(out)
    ref = occlusion_reference(x, params)
    assert out.shape == (N, 1, H, W)
    assert jnp.allclose(out, ref, atol=1e-5, rtol=1e-5), (
        f"max abs err = {jnp.max(jnp.abs(out - ref))}")

    # Second check: odd batch with explicit batch tile (exercises padding path).
    x3_in = jax.random.normal(jax.random.PRNGKey(1), (3, C, H, W), jnp.float32)
    out3 = jax.block_until_ready(occlusion_pallas(x3_in, params, tile_batch=2))
    ref3 = occlusion_reference(x3_in, params)
    assert out3.shape == (3, 1, H, W)
    assert jnp.allclose(out3, ref3, atol=1e-5, rtol=1e-5), (
        f"max abs err = {jnp.max(jnp.abs(out3 - ref3))}")

    print("KERNEL_OK")
</pallas_src>

<mosaic_0001>
module attributes {stable_mosaic.version = 11 : i64} {
  func.func @kernel(%arg0: i32, %arg1: memref<8xf32, #tpu.memory_space<smem>>, %arg2: memref<2x2x16x16xf32, #tpu.memory_space<vmem>>, %arg3: memref<2x1x16x16xf32, #tpu.memory_space<vmem>>) attributes {dimension_semantics = [#tpu.dimension_semantics<parallel>], iteration_bounds = array<i64: 1>, scalar_prefetch = 1 : i64, scratch_operands = 0 : i64, tpu.core_type = #tpu.core_type<tc>, window_params = [{transform_indices = @transform_0, window_bounds = array<i64: 2, 2, 16, 16>}, {transform_indices = @transform_1, window_bounds = array<i64: 2, 1, 16, 16>}]} {
    %c0 = arith.constant 0 : index
    %0 = memref.load %arg1[%c0] : memref<8xf32, #tpu.memory_space<smem>>
    %c1 = arith.constant 1 : index
    %1 = memref.load %arg1[%c1] : memref<8xf32, #tpu.memory_space<smem>>
    %c2 = arith.constant 2 : index
    %2 = memref.load %arg1[%c2] : memref<8xf32, #tpu.memory_space<smem>>
    %c3 = arith.constant 3 : index
    %3 = memref.load %arg1[%c3] : memref<8xf32, #tpu.memory_space<smem>>
    %c4 = arith.constant 4 : index
    %4 = memref.load %arg1[%c4] : memref<8xf32, #tpu.memory_space<smem>>
    %c5 = arith.constant 5 : index
    %5 = memref.load %arg1[%c5] : memref<8xf32, #tpu.memory_space<smem>>
    %c6 = arith.constant 6 : index
    %6 = memref.load %arg1[%c6] : memref<8xf32, #tpu.memory_space<smem>>
    %c7 = arith.constant 7 : index
    %7 = memref.load %arg1[%c7] : memref<8xf32, #tpu.memory_space<smem>>
    %c0_0 = arith.constant 0 : index
    %c0_1 = arith.constant 0 : index
    %c0_2 = arith.constant 0 : index
    %c0_3 = arith.constant 0 : index
    %8 = vector.load %arg2[%c0_0, %c0_1, %c0_2, %c0_3] : memref<2x2x16x16xf32, #tpu.memory_space<vmem>>, vector<2x1x16x16xf32>
    %9 = vector.shape_cast %8 : vector<2x1x16x16xf32> to vector<2x16x16xf32>
    %c0_4 = arith.constant 0 : index
    %c1_5 = arith.constant 1 : index
    %c0_6 = arith.constant 0 : index
    %c0_7 = arith.constant 0 : index
    %10 = vector.load %arg2[%c0_4, %c1_5, %c0_6, %c0_7] : memref<2x2x16x16xf32, #tpu.memory_space<vmem>>, vector<2x1x16x16xf32>
    %11 = vector.shape_cast %10 : vector<2x1x16x16xf32> to vector<2x16x16xf32>
    %12 = vector.broadcast %0 : f32 to vector<2x16x16xf32>
    %13 = arith.mulf %12, %9 : vector<2x16x16xf32>
    %14 = vector.broadcast %1 : f32 to vector<2x16x16xf32>
    %15 = arith.mulf %14, %11 : vector<2x16x16xf32>
    %16 = arith.addf %13, %15 : vector<2x16x16xf32>
    %17 = vector.broadcast %2 : f32 to vector<2x16x16xf32>
    %18 = arith.addf %16, %17 : vector<2x16x16xf32>
    %19 = arith.negf %18 : vector<2x16x16xf32>
    %20 = math.exp %19 : vector<2x16x16xf32>
    %cst = arith.constant 1.000000e+00 : f32
    %21 = vector.broadcast %cst : f32 to vector<2x16x16xf32>
    %22 = arith.addf %21, %20 : vector<2x16x16xf32>
    %23 = arith.divf %21, %22 : vector<2x16x16xf32>
    %24 = vector.broadcast %3 : f32 to vector<2x16x16xf32>
    %25 = arith.mulf %24, %9 : vector<2x16x16xf32>
    %26 = vector.broadcast %4 : f32 to vector<2x16x16xf32>
    %27 = arith.mulf %26, %11 : vector<2x16x16xf32>
    %28 = arith.addf %25, %27 : vector<2x16x16xf32>
    %29 = vector.broadcast %5 : f32 to vector<2x16x16xf32>
    %30 = arith.addf %28, %29 : vector<2x16x16xf32>
    %31 = arith.negf %30 : vector<2x16x16xf32>
    %32 = math.exp %31 : vector<2x16x16xf32>
    %cst_8 = arith.constant 1.000000e+00 : f32
    %33 = vector.broadcast %cst_8 : f32 to vector<2x16x16xf32>
    %34 = arith.addf %33, %32 : vector<2x16x16xf32>
    %35 = arith.divf %33, %34 : vector<2x16x16xf32>
    %cst_9 = arith.constant dense<0.000000e+00> : vector<2x16x16xf32>
    %36 = tpu.matmul %35, %23, %cst_9 {dimension_numbers = #tpu.dot_dimension_numbers<[2], [2], [1], [1], [0, 0, 0, 1, 1, 1], [0], [0]>} : vector<2x16x16xf32>, vector<2x16x16xf32>, vector<2x16x16xf32> -> vector<2x16x16xf32>
    %cst_10 = arith.constant dense<0.000000e+00> : vector<2x16x16xf32>
    %37 = tpu.matmul %36, %35, %cst_10 {dimension_numbers = #tpu.dot_dimension_numbers<[2], [1], [1], [2], [0, 0, 0, 1, 1, 2], [0], [0]>} : vector<2x16x16xf32>, vector<2x16x16xf32>, vector<2x16x16xf32> -> vector<2x16x16xf32>
    %38 = vector.broadcast %6 : f32 to vector<2x16x16xf32>
    %39 = arith.mulf %38, %37 : vector<2x16x16xf32>
    %40 = vector.broadcast %7 : f32 to vector<2x16x16xf32>
    %41 = arith.addf %39, %40 : vector<2x16x16xf32>
    %cst_11 = arith.constant 0.000000e+00 : f32
    %42 = vector.broadcast %cst_11 : f32 to vector<2x16x16xf32>
    %43 = arith.subf %42, %41 : vector<2x16x16xf32>
    %44 = arith.negf %43 : vector<2x16x16xf32>
    %45 = math.exp %44 : vector<2x16x16xf32>
    %cst_12 = arith.constant 1.000000e+00 : f32
    %46 = vector.broadcast %cst_12 : f32 to vector<2x16x16xf32>
    %47 = arith.addf %46, %45 : vector<2x16x16xf32>
    %48 = arith.divf %46, %47 : vector<2x16x16xf32>
    %c0_13 = arith.constant 0 : index
    %c0_14 = arith.constant 0 : index
    %c0_15 = arith.constant 0 : index
    %c0_16 = arith.constant 0 : index
    %49 = vector.load %arg3[%c0_13, %c0_14, %c0_15, %c0_16] : memref<2x1x16x16xf32, #tpu.memory_space<vmem>>, vector<2x1x16x16xf32>
    %50 = vector.shape_cast %49 : vector<2x1x16x16xf32> to vector<2x16x16xf32>
    %51 = vector.shape_cast %48 : vector<2x16x16xf32> to vector<2x1x16x16xf32>
    tpu.vector_store %arg3[%c0_13, %c0_14, %c0_15, %c0_16], %51 {strides = array<i32>} : memref<2x1x16x16xf32, #tpu.memory_space<vmem>>, vector<2x1x16x16xf32>,
    return
  }
  func.func @transform_0(%arg0: i32, %arg1: memref<8xf32, #tpu.memory_space<smem>>) -> (i32, i32, i32, i32) {
    %c0_i32 = arith.constant 0 : i32
    %c0_i32_0 = arith.constant 0 : i32
    %c0_i32_1 = arith.constant 0 : i32
    %c0_i32_2 = arith.constant 0 : i32
    return %arg0, %c0_i32, %c0_i32_0, %c0_i32_1 : i32, i32, i32, i32
  }
  func.func @transform_1(%arg0: i32, %arg1: memref<8xf32, #tpu.memory_space<smem>>) -> (i32, i32, i32, i32) {
    %c0_i32 = arith.constant 0 : i32
    %c0_i32_0 = arith.constant 0 : i32
    %c0_i32_1 = arith.constant 0 : i32
    %c0_i32_2 = arith.constant 0 : i32
    return %arg0, %c0_i32, %c0_i32_0, %c0_i32_1 : i32, i32, i32, i32
  }
}

</mosaic_0001>

<bundles_post_ra>
// kernel: tpu_custom_call.1
= control target key start
LH: loop header
LB: loop body
LE: loop exit
PB: predicated region body
PF: predicated region fallthrough
CT: control target
= control target key end

     0   :  { %s709_s9 = smov [#allocation3]   ;;  %s764_s0 = inlined_call_operand.hbm [shape: f32[8], index: 0, kind: input, shape index: {}]   ;;  %s765_s1 = inlined_call_operand.hbm [shape: f32[2,2,16,16], index: 1, kind: input, shape index: {}]   ;;  %s766_s2 = inlined_call_operand.hbm [shape: f32[2,1,16,16], index: 2, kind: output, shape index: {}]  }
   0x1   :  { %8 = dma.hbm_to_smem %s764_s0, 16, %s709_s9, [#allocation2] }
   0x2   :  { %703 = dma.done.wait [#allocation2], 16 }
   0x3   :  { %704 = vsyncadd [#allocation2], 4294967280 }
   0x4   :  { %10 = sfence }
   0x5   :  { %11 = vsyncpa [#allocation5], 0 }
   0x6   :  { %12 = vsyncpa [#allocation6], 0  ;;  %s710_s12 = smov [#allocation4]  }
   0x7   :  { %s18_s13 = sshll.u32 %s710_s12, 4  ;;  %s19_s13 = int_to_ptr.vmem [resolvable:$true] %s18_s13 }
   0x8   :  { %s671_s14 = scalar_lea.vmem %s19_s13, 1024  ;;  %p676_p1 = scmp.lt.s32.totalorder %s19_s13, %s19_s13 }
   0x9   :  { %p672_p0 = scmp.ne.s32.totalorder %s19_s13, %s671_s14  ;;  %p677_p2 = scmp.lt.s32.totalorder %s671_s14, %s671_s14 }
   0xb   :  { %p678_p3 = por %p677_p2, %p676_p1 }
   0xd   :  { %p679_p4 = pnand %p678_p3, %p672_p0 }
   0xf   :  { %682 = shalt.err (!%p679_p4)
}
  0x10   :  { %s711_s15 = smov 128   ;;  %s712_s16 = smov 8  }
  0x11   :  { %24 = dma.hbm_to_vmem [thread:$0]  %s765_s1, 1024, %s19_s13, [#allocation5], %s711_s15, %s711_s15, %s712_s16  }
  0x12   :  { %705 = dma.done.wait [#allocation5], 1024  }
  0x13   :  { %706 = vsyncadd [#allocation5], 4294966272  ;;  %s28_s18 = sld [smem:[#allocation3]]  ;;  %v36_v0 = vld [vmem:[#allocation4] sm:$0xff]  ;;  %v37_v1 = vld [vmem:[#allocation4 + $0x8] sm:$0xff]  ;;  %vm131_vm0 = vcmask 130048  }
  0x14   :  { %s527_s19 = sld [smem:[#allocation3 + $0x1]]  ;;  %v38_v2 = vld [vmem:[#allocation4 + $0x20] sm:$0xff]  ;;  %v41_v4 = vld [vmem:[#allocation4 + $0x10] sm:$0xff]  ;;  %v42_v5 = vld [vmem:[#allocation4 + $0x18] sm:$0xff]  ;;  %s713_s25 = smov [#allocation7]  }
  0x15   :  { %s528_s20 = sld [smem:[#allocation3 + $0x2]]  ;;  %v43_v6 = vld [vmem:[#allocation4 + $0x30] sm:$0xff]  ;;  %v39_v14 = vld [vmem:[#allocation4 + $0x28] sm:$0xff]  ;;  %v44_v15 = vld [vmem:[#allocation4 + $0x38] sm:$0xff]  ;;  %s515_s26 = sshll.u32 %s713_s25, 4  ;;  %s516_s26 = int_to_ptr.vmem [resolvable:$true] %s515_s26 }
  0x16   :  { %s529_s21 = sld [smem:[#allocation3 + $0x3]]  ;;  %s683_s27 = scalar_lea.vmem %s516_s26, 512 }
  0x17   :  { %s530_s22 = sld [smem:[#allocation3 + $0x4]]  ;;  %p684_p5 = scmp.ne.s32.totalorder %s516_s26, %s683_s27 }
  0x18   :  { %s531_s23 = sld [smem:[#allocation3 + $0x5]]  ;;  %p688_p6 = scmp.lt.s32.totalorder %s516_s26, %s516_s26 }
  0x19   :  { %v45_v3 = vstv %s28_s18  ;;  %s532_s1 = sld [smem:[#allocation3 + $0x6]]  ;;  %p689_p7 = scmp.lt.s32.totalorder %s683_s27, %s683_s27 }
  0x1a   :  { %v46_v7 = vmul.f32 %v45_v3, %v36_v0  ;;  %v47_v8 = vmul.f32 %v45_v3, %v37_v1  ;;  %v48_v9 = vmul.f32 %v45_v3, %v38_v2  ;;  %v50_v10 = vstv %s527_s19  ;;  %s533_s24 = sld [smem:[#allocation3 + $0x7]] }
  0x1b   :  { %v51_v11 = vmul.f32 %v50_v10, %v41_v4  ;;  %v52_v12 = vmul.f32 %v50_v10, %v42_v5  ;;  %v53_v13 = vmul.f32 %v50_v10, %v43_v6  ;;  %v59_v16 = vstv %s528_s20  ;;  %p690_p8 = por %p689_p7, %p688_p6 }
  0x1c   :  { %v88_v17 = vstv %s529_s21  ;;  %v49_v18 = vmul.f32 %v45_v3, %v39_v14  ;;  %v54_v19 = vmul.f32 %v50_v10, %v44_v15 }
  0x1d   :  { %v55_v20 = vadd.f32 %v51_v11, %v46_v7  ;;  %v56_v21 = vadd.f32 %v52_v12, %v47_v8  ;;  %v57_v22 = vadd.f32 %v53_v13, %v48_v9  ;;  %v89_v23 = vmul.f32 %v88_v17, %v36_v0  ;;  %p691_p9 = pnand %p690_p8, %p684_p5 }
  0x1e   :  { %v90_v24 = vmul.f32 %v88_v17, %v37_v1  ;;  %v91_v25 = vmul.f32 %v88_v17, %v38_v2  ;;  %v93_v26 = vstv %s530_s22  ;;  %v102_v27 = vstv %s531_s23 }
  0x1f   :  { %v60_v28 = vadd.f32 %v59_v16, %v55_v20  ;;  %v61_v29 = vadd.f32 %v59_v16, %v56_v21  ;;  %v62_v30 = vadd.f32 %v59_v16, %v57_v22  ;;  %v94_v31 = vmul.f32 %v93_v26, %v41_v4 }
  0x20   :  { %v95_v32 = vmul.f32 %v93_v26, %v42_v5  ;;  %v96_v33 = vmul.f32 %v93_v26, %v43_v6  ;;  %v58_v34 = vadd.f32 %v54_v19, %v49_v18  ;;  %v92_v35 = vmul.f32 %v88_v17, %v39_v14 }
  0x21   :  { %v534_v36 = vmul.f32 -1.442695, %v60_v28  ;;  %v535_v37 = vmul.f32 -1.442695, %v61_v29  ;;  %v536_v38 = vmul.f32 -1.442695, %v62_v30  ;;  %v98_v39 = vadd.f32 %v94_v31, %v89_v23 }
  0x22   :  { %v99_v40 = vadd.f32 %v95_v32, %v90_v24  ;;  %v100_v41 = vadd.f32 %v96_v33, %v91_v25  ;;  %v63_v42 = vadd.f32 %v59_v16, %v58_v34  ;;  %v97_v43 = vmul.f32 %v93_v26, %v44_v15 }
  0x23   :  { %607 = vpow2.f32 %v534_v36  ;;  %v103_v44 = vadd.f32 %v102_v27, %v98_v39  ;;  %v468_v18 = vstv %s532_s1  ;;  %v473_v20 = vstv %s533_s24 }
  0x24   :  { %609 = vpow2.f32 %v535_v37  ;;  %v104_v45 = vadd.f32 %v102_v27, %v99_v40  ;;  %v537_v46 = vmul.f32 -1.442695, %v63_v42  ;;  %v101_v47 = vadd.f32 %v97_v43, %v92_v35 }
  0x25   :  { %611 = vpow2.f32 %v536_v38  ;;  %v538_v48 = vmul.f32 -1.442695, %v103_v44  ;;  %v105_v49 = vadd.f32 %v102_v27, %v100_v41 }
  0x26   :  { %v539_v50 = vmul.f32 -1.442695, %v104_v45  ;;  %613 = vpow2.f32 %v537_v46  ;;  %v106_v51 = vadd.f32 %v102_v27, %v101_v47 }
  0x27   :  { %615 = vpow2.f32 %v538_v48  ;;  %v540_v52 = vmul.f32 -1.442695, %v105_v49 }
  0x28   :  { %617 = vpow2.f32 %v539_v50  ;;  %v541_v53 = vmul.f32 -1.442695, %v106_v51 }
  0x29   :  { %619 = vpow2.f32 %v540_v52 }
  0x2a   :  { %621 = vpow2.f32 %v541_v53 }
  0x30   :  { %v608_v54 = vpop.eup %607 }
  0x31   :  { %v610_v55 = vpop.eup %609  ;;  %v76_v56 = vadd.f32 1.0, %v608_v54 }
  0x32   :  { %v612_v57 = vpop.eup %611  ;;  %v77_v58 = vadd.f32 1.0, %v610_v55 }
  0x33   :  { %v614_v59 = vpop.eup %613  ;;  %v78_v60 = vadd.f32 1.0, %v612_v57  ;;  %623 = vrcp.f32 %v76_v56 }
  0x34   :  { %v616_v61 = vpop.eup %615  ;;  %625 = vrcp.f32 %v77_v58  ;;  %v79_v62 = vadd.f32 1.0, %v614_v59 }
  0x35   :  { %v618_v63 = vpop.eup %617  ;;  %627 = vrcp.f32 %v78_v60  ;;  %v119_v0 = vadd.f32 1.0, %v616_v61 }
  0x36   :  { %v620_v1 = vpop.eup %619  ;;  %v120_v2 = vadd.f32 1.0, %v618_v63  ;;  %629 = vrcp.f32 %v79_v62 }
  0x37   :  { %v622_v3 = vpop.eup %621  ;;  %631 = vrcp.f32 %v119_v0  ;;  %v121_v4 = vadd.f32 1.0, %v620_v1 }
  0x38   :  { %v122_v5 = vadd.f32 1.0, %v622_v3 }
  0x39   :  { %633 = vrcp.f32 %v121_v4 }
  0x3a   :  { %635 = vrcp.f32 %v120_v2 }
  0x3b   :  { %637 = vrcp.f32 %v122_v5 }
  0x40   :  { %v624_v6 = vpop.eup %623 }
  0x41   :  { %v626_v7 = vpop.eup %625 }
  0x42   :  { %v628_v8 = vpop.eup %627  ;;  %574 = vmatprep.subr.msk.mxu0 %vm131_vm0, %v626_v7 }
  0x43   :  { %v630_v9 = vpop.eup %629  ;;  %575 = vmatpush3.xpose.msk.msra.mxu0 %vm131_vm0, %v626_v7 }
  0x44   :  { %v632_v10 = vpop.eup %631  ;;  %581 = vmatprep.subr.msk.mxu1 %vm131_vm0, %v630_v9  ;;  %576 = vmatprep.subr.msk.mxu0 %vm131_vm0, %v624_v6 }
  0x45   :  { %582 = vmatpush3.xpose.msk.msra.mxu1 %vm131_vm0, %v630_v9  ;;  %578 = vmatprep.mubr.msk.f32.mxu0 %vm131_vm0, %v632_v10 }
  0x46   :  { %v634_v11 = vpop.eup %633  ;;  %583 = vmatprep.subr.msk.mxu1 %vm131_vm0, %v628_v8 }
  0x47   :  { %v636_v12 = vpop.eup %635  ;;  %577 = vmatpush3.xpose.msk.msra.mxu0 %vm131_vm0, %v624_v6  ;;  %585 = vmatprep.mubr.msk.f32.mxu1 %vm131_vm0, %v634_v11 }
  0x48   :  { %588 = vmatprep.subr.mxu0 %v636_v12  ;;  %v638_v13 = vpop.eup %637 }
  0x49   :  { %584 = vmatpush3.xpose.msk.msra.mxu1 %vm131_vm0, %v628_v8 }
  0x4a   :  { %579 = vmatmul.mubr.msk.f32.vlgmr.msra.gmra.mxu0 %vm131_vm0, %v636_v12  ;;  %595 = vmatprep.subr.mxu1 %v638_v13 }
  0x4b   :  { %589 = vmatpush3.msra.mxu0 %v636_v12 }
  0x4c   :  { %586 = vmatmul.mubr.msk.f32.vlgmr.msra.gmra.mxu1 %vm131_vm0, %v638_v13  ;;  %590 = vmatprep.subr.mxu0 %v632_v10 }
  0x4d   :  { %596 = vmatpush3.msra.mxu1 %v638_v13  ;;  %591 = vmatpush3.msra.mxu0 %v632_v10 }
  0x4e   :  { %597 = vmatprep.subr.mxu1 %v634_v11 }
  0x4f   :  { %598 = vmatpush3.msra.mxu1 %v634_v11 }
 0x10a   :  { %v580_v14 = vpop.f32.mrf.mxu0 }
 0x10c   :  { %v587_v15 = vpop.f32.mrf.mxu1  ;;  %v210_v16 = vpop.f32.mrf.mxu0 }
 0x10d   :  { %592 = vmatprep.mubr.msk.f32.mxu0 %vm131_vm0, %v210_v16 }
 0x10e   :  { %v297_v17 = vpop.f32.mrf.mxu1  ;;  %593 = vmatmul.mubr.msk.f32.vlgmr.msra.gmra.mxu0 %vm131_vm0, %v580_v14 }
 0x10f   :  { %599 = vmatprep.mubr.msk.f32.mxu1 %vm131_vm0, %v297_v17 }
 0x110   :  { %600 = vmatmul.mubr.msk.f32.vlgmr.msra.gmra.mxu1 %vm131_vm0, %v587_v15 }
 0x1ce   :  { %v594_v19 = vpop.f32.mrf.mxu0 }
 0x1cf   :  { %v470_v21 = vmul.f32 %v594_v19, %v468_v18 }
 0x1d0   :  { %v601_v22 = vpop.f32.mrf.mxu1  ;;  %v378_v23 = vpop.f32.mrf.mxu0 }
 0x1d1   :  { %v475_v24 = vadd.f32 %v473_v20, %v470_v21  ;;  %v472_v25 = vmul.f32 %v601_v22, %v468_v18  ;;  %v469_v26 = vmul.f32 %v468_v18, %v378_v23 }
 0x1d2   :  { %v459_v27 = vpop.f32.mrf.mxu1 }
 0x1d3   :  { %v479_v28 = vsub.f32 0.0, %v475_v24  ;;  %v477_v29 = vadd.f32 %v473_v20, %v472_v25  ;;  %v474_v30 = vadd.f32 %v473_v20, %v469_v26  ;;  %v471_v31 = vmul.f32 %v468_v18, %v459_v27 }
 0x1d5   :  { %v555_v32 = vmul.f32 -1.442695, %v479_v28  ;;  %v481_v33 = vsub.f32 0.0, %v477_v29  ;;  %v478_v34 = vsub.f32 0.0, %v474_v30  ;;  %v476_v35 = vadd.f32 %v473_v20, %v471_v31 }
 0x1d7   :  { %639 = vpow2.f32 %v555_v32  ;;  %v557_v36 = vmul.f32 -1.442695, %v481_v33  ;;  %v554_v37 = vmul.f32 -1.442695, %v478_v34  ;;  %v480_v38 = vsub.f32 0.0, %v476_v35 }
 0x1d9   :  { %641 = vpow2.f32 %v557_v36  ;;  %v556_v39 = vmul.f32 -1.442695, %v480_v38 }
 0x1da   :  { %643 = vpow2.f32 %v554_v37 }
 0x1db   :  { %645 = vpow2.f32 %v556_v39 }
 0x1e4   :  { %v640_v40 = vpop.eup %639 }
 0x1e5   :  { %v495_v41 = vadd.f32 1.0, %v640_v40 }
 0x1e6   :  { %v642_v42 = vpop.eup %641 }
 0x1e7   :  { %v644_v43 = vpop.eup %643  ;;  %647 = vrcp.f32 %v495_v41  ;;  %v497_v44 = vadd.f32 1.0, %v642_v42 }
 0x1e8   :  { %v646_v45 = vpop.eup %645  ;;  %v494_v46 = vadd.f32 1.0, %v644_v43 }
 0x1e9   :  { %649 = vrcp.f32 %v497_v44  ;;  %v496_v47 = vadd.f32 1.0, %v646_v45 }
 0x1ea   :  { %651 = vrcp.f32 %v494_v46 }
 0x1eb   :  { %653 = vrcp.f32 %v496_v47 }
 0x1f4   :  { %v648_v48 = vpop.eup %647 }
 0x1f5   :  { %507 = vst.msk [vmem:[#allocation7 + $0x8] sm:$0xff] %vm131_vm0, %v648_v48 }
 0x1f6   :  { %v650_v49 = vpop.eup %649 }
 0x1f7   :  { %v652_v50 = vpop.eup %651  ;;  %509 = vst.msk [vmem:[#allocation7 + $0x18] sm:$0xff] %vm131_vm0, %v650_v49 }
 0x1f8   :  { %v654_v51 = vpop.eup %653  ;;  %506 = vst.msk [vmem:[#allocation7] sm:$0xff] %vm131_vm0, %v652_v50 }
 0x1f9   :  { %508 = vst.msk [vmem:[#allocation7 + $0x10] sm:$0xff] %vm131_vm0, %v654_v51 }
 0x1fa   :  { %694 = shalt.err (!%p691_p9)
}
 0x1fb   :  { %521 = dma.vmem_to_hbm [thread:$0]  %s516_s26, 512, %s766_s2, [#allocation6], %s711_s15, %s711_s15, %s712_s16  }
 0x1fc   :  { %707 = dma.done.wait [#allocation6], 512  }
 0x1fd   :  { %708 = vsyncadd [#allocation6], 4294966784 }
 0x1fe   :  { %525 = vsyncpa [#allocation5], 1 }
 0x1ff   :  { %526 = vsyncpa [#allocation6], 1 }

</bundles_post_ra>
